<compile_context>
chip_gen: v7x
topology: tpu7x:2x2x1
jax: 0.10.0
libtpu: 0.0.40
codegen_flags: <defaults>
</compile_context>

<pallas_src>
import jax
import jax.numpy as jnp
from jax.experimental import pallas as pl
from jax.experimental.pallas import tpu as pltpu


def linear_kernel(x_ref, w_ref, b_ref, o_ref):
    # x_ref: [2, TILE] f32 in VMEM (K on sublanes, batch on lanes).
    # w_ref: (2,) f32 in SMEM; b_ref: (1,) f32 in SMEM.
    # o_ref: [1, TILE] f32 in VMEM (lane-dense output row).
    w0 = w_ref[0]
    w1 = w_ref[1]
    b = b_ref[0]
    x0 = x_ref[0:1, :]  # [1, TILE] full-lane-width vregs
    x1 = x_ref[1:2, :]
    # Pure VPU: two scalar-broadcast multiplies + adds. No MXU, no transpose.
    o_ref[...] = (x0 * w0 + x1 * w1 + b).astype(o_ref.dtype)


def linear_regression_forward(features, weight, bias, *, tile_lanes=65536):
    """features: [B, 2] f32, weight: [1, 2] f32, bias: [1] f32 -> [B, 1] f32."""
    B, K = features.shape
    N = weight.shape[0]  # 1
    assert K == 2 and N == 1

    # Lane-dense repack: batch on the 128-lane axis, K on sublanes.
    # (Layout plumbing only; ideally the producer emits [2, B] directly.)
    x_t = features.T            # [2, B]
    w_flat = weight.reshape(-1)  # (2,)

    # Lane-axis tile. Block last dim must be a multiple of 128 or equal the
    # full array dim; the tiny sublane dims (2 / 1) use the full-dim escape.
    if B < 128:
        tile = B  # full-dim escape hatch for tiny batches (e.g. the demo B=8)
    elif B <= 2 * 128:
        tile = pl.cdiv(B, 128) * 128
    else:
        # >= 2 lane-tiles available: cap the tile so (a) the grid has >= 2
        # steps (both v7x TensorCores split the "parallel" batch axis) and
        # (b) double-buffered blocks stay MiB-scale inside v7x's 64 MiB VMEM.
        tile = min(tile_lanes, pl.cdiv(pl.cdiv(B, 2), 128) * 128)

    grid = (pl.cdiv(B, tile),)  # ragged last block handled by Pallas (no pad)

    out = pl.pallas_call(
        linear_kernel,
        out_shape=jax.ShapeDtypeStruct((1, B), features.dtype),
        grid=grid,
        in_specs=[
            # Activations: tiled over the lane (batch) axis, auto-pipelined.
            pl.BlockSpec((K, tile), lambda i: (0, i)),
            # Parameters: tiny, untiled, resident in SMEM as 1-D scalars.
            pl.BlockSpec(memory_space=pltpu.MemorySpace.SMEM),
            pl.BlockSpec(memory_space=pltpu.MemorySpace.SMEM),
        ],
        out_specs=pl.BlockSpec((1, tile), lambda i: (0, i)),
        compiler_params=pltpu.CompilerParams(
            dimension_semantics=("parallel",),
        ),
    )(x_t, w_flat, bias)

    # [1, B] lane-dense slab -> [B, 1] (cheap contiguous reshape).
    return out.reshape(B, N)


if __name__ == "__main__":
    key = jax.random.PRNGKey(0)
    k_x, k_w, k_b = jax.random.split(key, 3)

    batch = 8
    in_features, out_features = 2, 1

    # Deterministic parameter init mimicking torch.nn.Linear
    # (U[-1/sqrt(fan_in), 1/sqrt(fan_in)]).
    bound = 1.0 / jnp.sqrt(jnp.float32(in_features))
    weight = jax.random.uniform(
        k_w, (out_features, in_features), jnp.float32, -bound, bound
    )
    bias = jax.random.uniform(k_b, (out_features,), jnp.float32, -bound, bound)

    features = jax.random.normal(k_x, (batch, in_features), jnp.float32)

    out = linear_regression_forward(features, weight, bias)
    out = jax.block_until_ready(out)

    # Reference check in plain JAX.
    ref = features @ weight.T + bias
    assert out.shape == (batch, out_features)
    assert jnp.allclose(out, ref, atol=1e-6, rtol=1e-6)

    print("KERNEL_OK")
</pallas_src>

<mosaic_0001>
module attributes {stable_mosaic.version = 11 : i64} {
  func.func @linear_kernel(%arg0: i32, %arg1: memref<2x8xf32, #tpu.memory_space<vmem>>, %arg2: memref<2xf32, #tpu.memory_space<smem>>, %arg3: memref<1xf32, #tpu.memory_space<smem>>, %arg4: memref<1x8xf32, #tpu.memory_space<vmem>>) attributes {dimension_semantics = [#tpu.dimension_semantics<parallel>], iteration_bounds = array<i64: 1>, scalar_prefetch = 0 : i64, scratch_operands = 0 : i64, tpu.core_type = #tpu.core_type<tc>, window_params = [{transform_indices = @transform_0, window_bounds = array<i64: 2, 8>}, {transform_indices = @transform_1, window_bounds = array<i64: 2>}, {transform_indices = @transform_2, window_bounds = array<i64: 1>}, {transform_indices = @transform_3, window_bounds = array<i64: 1, 8>}]} {
    %c0 = arith.constant 0 : index
    %0 = memref.load %arg2[%c0] : memref<2xf32, #tpu.memory_space<smem>>
    %c1 = arith.constant 1 : index
    %1 = memref.load %arg2[%c1] : memref<2xf32, #tpu.memory_space<smem>>
    %c0_0 = arith.constant 0 : index
    %2 = memref.load %arg3[%c0_0] : memref<1xf32, #tpu.memory_space<smem>>
    %c0_1 = arith.constant 0 : index
    %c0_2 = arith.constant 0 : index
    %3 = vector.load %arg1[%c0_1, %c0_2] : memref<2x8xf32, #tpu.memory_space<vmem>>, vector<1x8xf32>
    %c1_3 = arith.constant 1 : index
    %c0_4 = arith.constant 0 : index
    %4 = vector.load %arg1[%c1_3, %c0_4] : memref<2x8xf32, #tpu.memory_space<vmem>>, vector<1x8xf32>
    %5 = vector.broadcast %0 : f32 to vector<1x8xf32>
    %6 = arith.mulf %3, %5 : vector<1x8xf32>
    %7 = vector.broadcast %1 : f32 to vector<1x8xf32>
    %8 = arith.mulf %4, %7 : vector<1x8xf32>
    %9 = arith.addf %6, %8 : vector<1x8xf32>
    %10 = vector.broadcast %2 : f32 to vector<1x8xf32>
    %11 = arith.addf %9, %10 : vector<1x8xf32>
    %c0_5 = arith.constant 0 : index
    %c0_6 = arith.constant 0 : index
    %12 = vector.load %arg4[%c0_5, %c0_6] : memref<1x8xf32, #tpu.memory_space<vmem>>, vector<1x8xf32>
    tpu.vector_store %arg4[%c0_5, %c0_6], %11 {strides = array<i32>} : memref<1x8xf32, #tpu.memory_space<vmem>>, vector<1x8xf32>,
    return
  }
  func.func @transform_0(%arg0: i32) -> (i32, i32) {
    %c0_i32 = arith.constant 0 : i32
    %c0_i32_0 = arith.constant 0 : i32
    return %c0_i32, %arg0 : i32, i32
  }
  func.func @transform_1(%arg0: i32) -> i32 {
    %c0_i32 = arith.constant 0 : i32
    %c0_i32_0 = arith.constant 0 : i32
    return %c0_i32 : i32
  }
  func.func @transform_2(%arg0: i32) -> i32 {
    %c0_i32 = arith.constant 0 : i32
    %c0_i32_0 = arith.constant 0 : i32
    return %c0_i32 : i32
  }
  func.func @transform_3(%arg0: i32) -> (i32, i32) {
    %c0_i32 = arith.constant 0 : i32
    %c0_i32_0 = arith.constant 0 : i32
    return %c0_i32, %arg0 : i32, i32
  }
}

</mosaic_0001>

<bundles_post_ra>
// kernel: tpu_custom_call.1
= control target key start
LH: loop header
LB: loop body
LE: loop exit
PB: predicated region body
PF: predicated region fallthrough
CT: control target
= control target key end

     0   :  { %9 = vsyncpa [#allocation5], 0  ;;  %s145_s0 = inlined_call_operand.vmem [shape: f32[2,8], index: 0, kind: input, shape index: {}]   ;;  %s146_s1 = inlined_call_operand.vmem [shape: f32[2], index: 1, kind: input, shape index: {}]   ;;  %s147_s2 = inlined_call_operand.<no memory space> [shape: f32[1], index: 2, kind: input, shape index: {}]   ;;  %s148_s3 = inlined_call_operand.hbm [shape: f32[1,8], index: 3, kind: output, shape index: {}]  }
   0x1   :  { %10 = vsyncpa [#allocation4], 0  ;;  %s19_s14 = sshll.u32 %s146_s1, 4  ;;  %s20_s14 = int_to_ptr.vmem [resolvable:$true] %s19_s14 }
   0x2   :  { %s61_s15 = scalar_lea.vmem %s20_s14, 16  ;;  %p66_p1 = scmp.lt.s32.totalorder %s20_s14, %s20_s14 }
   0x3   :  { %p62_p0 = scmp.ne.s32.totalorder %s20_s14, %s61_s15  ;;  %p67_p2 = scmp.lt.s32.totalorder %s61_s15, %s61_s15 }
   0x5   :  { %p68_p3 = por %p67_p2, %p66_p1 }
   0x7   :  { %p69_p4 = pnand %p68_p3, %p62_p0 }
   0x9   :  { %72 = shalt.err (!%p69_p4)
}
   0xa   :  { %s99_s16 = smov [#allocation3]  }
   0xb   :  { %22 = dma.vmem_to_smem %s20_s14, 16, %s99_s16, [#allocation5]  }
   0xc   :  { %95 = dma.done.wait [#allocation5], 16  }
   0xd   :  { %96 = vsyncadd [#allocation5], 4294967280 }
   0xe   :  { %28 = sfence }
   0xf   :  { %s29_s17 = sld [smem:[#allocation3]]  ;;  %s58_s18 = sld [smem:[#allocation3 + $0x1]]  ;;  %v32_v0 = vld [vmem:[%s145_s0] sm:$0x1]  ;;  %v33_v1 = vld [vmem:[%s145_s0 + $0x1] sm:$0x1]  ;;  %v39_v6 = vstv %s147_s2 }
  0x10   :  { %s100_s24 = smov [#allocation6]   ;;  %vm41_vm0 = vcmask 57344  }
  0x11   :  { %s49_s25 = sshll.u32 %s100_s24, 4  ;;  %s50_s25 = int_to_ptr.vmem [resolvable:$true] %s49_s25 }
  0x12   :  { %s73_s26 = scalar_lea.vmem %s50_s25, 16  ;;  %s77_s27 = scalar_lea.vmem %s50_s25, 32 }
  0x13   :  { %p74_p5 = scmp.ne.s32.totalorder %s50_s25, %s73_s26  ;;  %p78_p6 = scmp.lt.s32.totalorder %s50_s25, %s50_s25 }
  0x14   :  { %p79_p7 = scmp.lt.s32.totalorder %s77_s27, %s73_s26 }
  0x15   :  { %v34_v2 = vstv %s29_s17  ;;  %v36_v3 = vstv %s58_s18 }
  0x16   :  { %v35_v4 = vmul.f32 %v34_v2, %v32_v0  ;;  %v37_v5 = vmul.f32 %v36_v3, %v33_v1  ;;  %p80_p8 = por %p79_p7, %p78_p6 }
  0x18   :  { %v38_v7 = vadd.f32 %v37_v5, %v35_v4  ;;  %p81_p9 = pnand %p80_p8, %p74_p5 }
  0x1a   :  { %v40_v8 = vadd.f32 %v39_v6, %v38_v7 }
  0x1c   :  { %42 = vst.msk [vmem:[#allocation6] sm:$0x1] %vm41_vm0, %v40_v8 }
  0x1d   :  { %84 = shalt.err (!%p81_p9)
}
  0x1e   :  { %s85_s29 = scalar_lea.hbm %s148_s3, 16 }
  0x1f   :  { %p86_p10 = scmp.ne.s32.totalorder %s148_s3, %s85_s29  ;;  %p89_p11 = scmp.lt.u32.totalorder %s85_s29, %s148_s3 }
  0x21   :  { %p91_p12 = pnand %p89_p11, %p86_p10 }
  0x23   :  { %94 = shalt.err (!%p91_p12)
}
  0x24   :  { %52 = dma.vmem_to_hbm [thread:$0]  %s50_s25, 16, %s148_s3, [#allocation4]  }
  0x25   :  { %97 = dma.done.wait [#allocation4], 16  }
  0x26   :  { %98 = vsyncadd [#allocation4], 4294967280 }
  0x27   :  { %56 = vsyncpa [#allocation4], 1 }
  0x28   :  { %57 = vsyncpa [#allocation5], 1 }

</bundles_post_ra>
